<compile_context>
chip_gen: v6e
topology: v6e:2x2x1
jax: 0.10.0
libtpu: 0.0.40
codegen_flags: <defaults>
</compile_context>

<pallas_src>
import math
from functools import partial

import jax
import jax.numpy as jnp
from jax import lax
from jax.experimental import pallas as pl
from jax.experimental.pallas import tpu as pltpu


def _gelu_tail(v1):
    # Exactly mirrors the PyTorch graph v1 -> v10.
    v2 = v1 * 0.5
    v3 = v1 * v1
    v4 = v3 * v1
    v5 = v4 * 0.044715
    v6 = v1 + v5
    v7 = v6 * 0.7978845608028654
    v8 = jnp.tanh(v7)
    v9 = v8 + 1.0
    return v2 * v9


def _conv_gelu_kernel(x_ref, w_ref, b_ref, o_ref, xs_ref, *,
                      N, H, W, KH, KW, PAD, HO_PAD, BAND_R0, LANE):
    """Single-invocation fused pad + 1->1 conv2d + tanh-GELU for the whole batch.

    x_ref : (N, 1, H, W)          raw input (native NCHW), VMEM
    w_ref : (KH*KW,)              flattened conv weights, SMEM (scalar reads)
    b_ref : (1,)                  conv bias, SMEM
    o_ref : (N, HO_PAD, LANE)     sublane/lane-aligned output slab, VMEM
    xs_ref: (N*8 + 8, 2*LANE)     zero-padded live-band scratch, VMEM
    """
    NB = N * 8
    b0 = b_ref[0]

    # 1) Constant region: with PAD >= kernel extent, every output element
    #    outside the live band is exactly gelu(bias). Build one (8, LANE)
    #    constant tile (tanh runs on the EUP over a full vreg, not a scalar).
    cvec = _gelu_tail(jnp.full((8, LANE), b0, dtype=jnp.float32))

    # 2) Build the zero-padded band window once. Batch n's input rows sit at
    #    sublanes [8n + (PAD - BAND_R0), ...), data columns at [PAD, PAD + W).
    #    Halo rows/cols stay zero so every conv tap outside the data reads 0.
    xs_ref[...] = jnp.zeros_like(xs_ref)
    r_in = PAD - BAND_R0
    for n in range(N):
        xs_ref[8 * n + r_in:8 * n + r_in + H, PAD:PAD + W] = x_ref[n, 0]

    # 3) 14-tap direct convolution over the stacked (N*8, LANE) band on the
    #    VPU; bias folded into the accumulator init (no separate add).
    acc = jnp.full((NB, LANE), b0, dtype=jnp.float32)
    for kh in range(KH):
        for kw in range(KW):
            acc = acc + xs_ref[kh:kh + NB, kw:kw + LANE] * w_ref[kh * KW + kw]
    band = _gelu_tail(acc)

    # 4) Fully aligned, unmasked stores: constant 8-row chunks everywhere
    #    except the band chunk, which gets the computed values.
    for n in range(N):
        for r0 in range(0, HO_PAD, 8):
            if r0 == BAND_R0:
                o_ref[n, r0:r0 + 8, :] = band[8 * n:8 * n + 8, :]
            else:
                o_ref[n, r0:r0 + 8, :] = cvec


@partial(jax.jit, static_argnames=("padding",))
def model_forward(x_nchw, weight, bias, padding=10):
    """x_nchw: (N, 1, H, W); weight: (1, 1, KH, KW); bias: (1,). Returns NCHW."""
    N, C, H, W = x_nchw.shape
    assert C == 1
    KH, KW = int(weight.shape[2]), int(weight.shape[3])
    HO = H + 2 * padding - KH + 1
    WO = W + 2 * padding - KW + 1

    LANE = 128                                   # lane-dense output width
    HO_PAD = pl.cdiv(HO, 8) * 8                  # sublane-dense output height
    BAND_R0 = ((padding - (KH - 1)) // 8) * 8    # 8-aligned start of live band

    # Shape-specialization guards (all hold for PAD=10, k=(2,7), x=(2,1,3,24)).
    assert padding >= KH - 1 and padding >= KW - 1
    assert WO <= LANE and padding + W <= LANE          # live cols fit in 128 lanes
    assert 0 <= BAND_R0 and BAND_R0 + 8 <= HO_PAD      # band chunk inside slab
    r_in = padding - BAND_R0
    assert r_in >= KH - 1 and r_in + H <= 8            # band + halo fit in 8 rows

    x = x_nchw.astype(jnp.float32)                     # no-op for f32 inputs
    w_flat = weight.reshape(-1).astype(jnp.float32)    # (KH*KW,)
    b = bias.astype(jnp.float32)                       # (1,)

    kernel = partial(_conv_gelu_kernel, N=N, H=H, W=W, KH=KH, KW=KW,
                     PAD=padding, HO_PAD=HO_PAD, BAND_R0=BAND_R0, LANE=LANE)

    out = pl.pallas_call(
        kernel,
        out_shape=jax.ShapeDtypeStruct((N, HO_PAD, LANE), jnp.float32),
        in_specs=[
            pl.BlockSpec(memory_space=pltpu.MemorySpace.VMEM),
            pl.BlockSpec(memory_space=pltpu.MemorySpace.SMEM),
            pl.BlockSpec(memory_space=pltpu.MemorySpace.SMEM),
        ],
        out_specs=pl.BlockSpec(memory_space=pltpu.MemorySpace.VMEM),
        scratch_shapes=[pltpu.VMEM((N * 8 + 8, 2 * LANE), jnp.float32)],
    )(x, w_flat, b)

    # Slice the aligned slab back to the true output extent; restore NCHW.
    return out[:, :HO, :WO][:, None, :, :]


def reference_forward(x_nchw, weight, bias, padding=10):
    v1 = lax.conv_general_dilated(
        x_nchw, weight, window_strides=(1, 1),
        padding=[(padding, padding), (padding, padding)],
        dimension_numbers=("NCHW", "OIHW", "NCHW"),
    ) + bias.reshape(1, -1, 1, 1)
    v2 = v1 * 0.5
    v7 = (v1 + (v1 * v1 * v1) * 0.044715) * 0.7978845608028654
    return v2 * (jnp.tanh(v7) + 1.0)


if __name__ == "__main__":
    key = jax.random.PRNGKey(0)
    kx, kw_key, kb_key = jax.random.split(key, 3)

    # Input matching the module's expected shape: (2, 1, 3, 24), NCHW.
    x = jax.random.normal(kx, (2, 1, 3, 24), dtype=jnp.float32)

    # Deterministic Conv2d(1, 1, (2, 7)) params, PyTorch-style uniform init.
    fan_in = 1 * 2 * 7
    bound = 1.0 / math.sqrt(fan_in)
    weight = jax.random.uniform(kw_key, (1, 1, 2, 7), jnp.float32, -bound, bound)
    bias = jax.random.uniform(kb_key, (1,), jnp.float32, -bound, bound)

    out = jax.block_until_ready(model_forward(x, weight, bias))

    ref = reference_forward(x, weight, bias)
    assert out.shape == (2, 1, 22, 38), out.shape
    assert jnp.allclose(out, ref, atol=1e-5, rtol=1e-5), (
        float(jnp.max(jnp.abs(out - ref))))

    print("KERNEL_OK")
</pallas_src>

<mosaic_0001>
module attributes {stable_mosaic.version = 11 : i64} {
  func.func @_conv_gelu_kernel(%arg0: memref<2x1x3x24xf32, #tpu.memory_space<vmem>>, %arg1: memref<14xf32, #tpu.memory_space<smem>>, %arg2: memref<1xf32, #tpu.memory_space<smem>>, %arg3: memref<2x24x128xf32, #tpu.memory_space<vmem>>, %arg4: memref<24x256xf32, #tpu.memory_space<vmem>>) attributes {dimension_semantics = [], scalar_prefetch = 0 : i64, scratch_operands = 1 : i64, tpu.core_type = #tpu.core_type<tc>} {
    %c0 = arith.constant 0 : index
    %0 = memref.load %arg2[%c0] : memref<1xf32, #tpu.memory_space<smem>>
    %1 = vector.broadcast %0 : f32 to vector<8x128xf32>
    %cst = arith.constant 5.000000e-01 : f32
    %2 = vector.broadcast %cst : f32 to vector<8x128xf32>
    %3 = arith.mulf %1, %2 : vector<8x128xf32>
    %4 = arith.mulf %1, %1 : vector<8x128xf32>
    %5 = arith.mulf %4, %1 : vector<8x128xf32>
    %cst_0 = arith.constant 4.471500e-02 : f32
    %6 = vector.broadcast %cst_0 : f32 to vector<8x128xf32>
    %7 = arith.mulf %5, %6 : vector<8x128xf32>
    %8 = arith.addf %1, %7 : vector<8x128xf32>
    %cst_1 = arith.constant 0.797884583 : f32
    %9 = vector.broadcast %cst_1 : f32 to vector<8x128xf32>
    %10 = arith.mulf %8, %9 : vector<8x128xf32>
    %11 = math.tanh %10 : vector<8x128xf32>
    %cst_2 = arith.constant 1.000000e+00 : f32
    %12 = vector.broadcast %cst_2 : f32 to vector<8x128xf32>
    %13 = arith.addf %11, %12 : vector<8x128xf32>
    %14 = arith.mulf %3, %13 : vector<8x128xf32>
    %cst_3 = arith.constant 0.000000e+00 : f32
    %15 = vector.broadcast %cst_3 : f32 to vector<24x256xf32>
    %c0_4 = arith.constant 0 : index
    %c0_5 = arith.constant 0 : index
    %16 = vector.load %arg4[%c0_4, %c0_5] : memref<24x256xf32, #tpu.memory_space<vmem>>, vector<24x256xf32>
    tpu.vector_store %arg4[%c0_4, %c0_5], %15 {strides = array<i32>} : memref<24x256xf32, #tpu.memory_space<vmem>>, vector<24x256xf32>,
    %c0_6 = arith.constant 0 : index
    %c0_7 = arith.constant 0 : index
    %c0_8 = arith.constant 0 : index
    %c0_9 = arith.constant 0 : index
    %17 = vector.load %arg0[%c0_6, %c0_7, %c0_8, %c0_9] : memref<2x1x3x24xf32, #tpu.memory_space<vmem>>, vector<1x1x3x24xf32>
    %18 = vector.shape_cast %17 : vector<1x1x3x24xf32> to vector<3x24xf32>
    %c2 = arith.constant 2 : index
    %c10 = arith.constant 10 : index
    %19 = vector.load %arg4[%c2, %c10] : memref<24x256xf32, #tpu.memory_space<vmem>>, vector<3x24xf32>
    tpu.vector_store %arg4[%c2, %c10], %18 {strides = array<i32>} : memref<24x256xf32, #tpu.memory_space<vmem>>, vector<3x24xf32>,
    %c1 = arith.constant 1 : index
    %c0_10 = arith.constant 0 : index
    %c0_11 = arith.constant 0 : index
    %c0_12 = arith.constant 0 : index
    %20 = vector.load %arg0[%c1, %c0_10, %c0_11, %c0_12] : memref<2x1x3x24xf32, #tpu.memory_space<vmem>>, vector<1x1x3x24xf32>
    %21 = vector.shape_cast %20 : vector<1x1x3x24xf32> to vector<3x24xf32>
    %c10_13 = arith.constant 10 : index
    %c10_14 = arith.constant 10 : index
    %22 = vector.load %arg4[%c10_13, %c10_14] : memref<24x256xf32, #tpu.memory_space<vmem>>, vector<3x24xf32>
    tpu.vector_store %arg4[%c10_13, %c10_14], %21 {strides = array<i32>} : memref<24x256xf32, #tpu.memory_space<vmem>>, vector<3x24xf32>,
    %23 = vector.broadcast %0 : f32 to vector<16x128xf32>
    %c0_15 = arith.constant 0 : index
    %c0_16 = arith.constant 0 : index
    %24 = vector.load %arg4[%c0_15, %c0_16] : memref<24x256xf32, #tpu.memory_space<vmem>>, vector<16x128xf32>
    %c0_17 = arith.constant 0 : index
    %25 = memref.load %arg1[%c0_17] : memref<14xf32, #tpu.memory_space<smem>>
    %26 = vector.broadcast %25 : f32 to vector<16x128xf32>
    %27 = arith.mulf %24, %26 : vector<16x128xf32>
    %28 = arith.addf %23, %27 : vector<16x128xf32>
    %c0_18 = arith.constant 0 : index
    %c1_19 = arith.constant 1 : index
    %29 = vector.load %arg4[%c0_18, %c1_19] : memref<24x256xf32, #tpu.memory_space<vmem>>, vector<16x128xf32>
    %c1_20 = arith.constant 1 : index
    %30 = memref.load %arg1[%c1_20] : memref<14xf32, #tpu.memory_space<smem>>
    %31 = vector.broadcast %30 : f32 to vector<16x128xf32>
    %32 = arith.mulf %29, %31 : vector<16x128xf32>
    %33 = arith.addf %28, %32 : vector<16x128xf32>
    %c0_21 = arith.constant 0 : index
    %c2_22 = arith.constant 2 : index
    %34 = vector.load %arg4[%c0_21, %c2_22] : memref<24x256xf32, #tpu.memory_space<vmem>>, vector<16x128xf32>
    %c2_23 = arith.constant 2 : index
    %35 = memref.load %arg1[%c2_23] : memref<14xf32, #tpu.memory_space<smem>>
    %36 = vector.broadcast %35 : f32 to vector<16x128xf32>
    %37 = arith.mulf %34, %36 : vector<16x128xf32>
    %38 = arith.addf %33, %37 : vector<16x128xf32>
    %c0_24 = arith.constant 0 : index
    %c3 = arith.constant 3 : index
    %39 = vector.load %arg4[%c0_24, %c3] : memref<24x256xf32, #tpu.memory_space<vmem>>, vector<16x128xf32>
    %c3_25 = arith.constant 3 : index
    %40 = memref.load %arg1[%c3_25] : memref<14xf32, #tpu.memory_space<smem>>
    %41 = vector.broadcast %40 : f32 to vector<16x128xf32>
    %42 = arith.mulf %39, %41 : vector<16x128xf32>
    %43 = arith.addf %38, %42 : vector<16x128xf32>
    %c0_26 = arith.constant 0 : index
    %c4 = arith.constant 4 : index
    %44 = vector.load %arg4[%c0_26, %c4] : memref<24x256xf32, #tpu.memory_space<vmem>>, vector<16x128xf32>
    %c4_27 = arith.constant 4 : index
    %45 = memref.load %arg1[%c4_27] : memref<14xf32, #tpu.memory_space<smem>>
    %46 = vector.broadcast %45 : f32 to vector<16x128xf32>
    %47 = arith.mulf %44, %46 : vector<16x128xf32>
    %48 = arith.addf %43, %47 : vector<16x128xf32>
    %c0_28 = arith.constant 0 : index
    %c5 = arith.constant 5 : index
    %49 = vector.load %arg4[%c0_28, %c5] : memref<24x256xf32, #tpu.memory_space<vmem>>, vector<16x128xf32>
    %c5_29 = arith.constant 5 : index
    %50 = memref.load %arg1[%c5_29] : memref<14xf32, #tpu.memory_space<smem>>
    %51 = vector.broadcast %50 : f32 to vector<16x128xf32>
    %52 = arith.mulf %49, %51 : vector<16x128xf32>
    %53 = arith.addf %48, %52 : vector<16x128xf32>
    %c0_30 = arith.constant 0 : index
    %c6 = arith.constant 6 : index
    %54 = vector.load %arg4[%c0_30, %c6] : memref<24x256xf32, #tpu.memory_space<vmem>>, vector<16x128xf32>
    %c6_31 = arith.constant 6 : index
    %55 = memref.load %arg1[%c6_31] : memref<14xf32, #tpu.memory_space<smem>>
    %56 = vector.broadcast %55 : f32 to vector<16x128xf32>
    %57 = arith.mulf %54, %56 : vector<16x128xf32>
    %58 = arith.addf %53, %57 : vector<16x128xf32>
    %c1_32 = arith.constant 1 : index
    %c0_33 = arith.constant 0 : index
    %59 = vector.load %arg4[%c1_32, %c0_33] : memref<24x256xf32, #tpu.memory_space<vmem>>, vector<16x128xf32>
    %c7 = arith.constant 7 : index
    %60 = memref.load %arg1[%c7] : memref<14xf32, #tpu.memory_space<smem>>
    %61 = vector.broadcast %60 : f32 to vector<16x128xf32>
    %62 = arith.mulf %59, %61 : vector<16x128xf32>
    %63 = arith.addf %58, %62 : vector<16x128xf32>
    %c1_34 = arith.constant 1 : index
    %c1_35 = arith.constant 1 : index
    %64 = vector.load %arg4[%c1_34, %c1_35] : memref<24x256xf32, #tpu.memory_space<vmem>>, vector<16x128xf32>
    %c8 = arith.constant 8 : index
    %65 = memref.load %arg1[%c8] : memref<14xf32, #tpu.memory_space<smem>>
    %66 = vector.broadcast %65 : f32 to vector<16x128xf32>
    %67 = arith.mulf %64, %66 : vector<16x128xf32>
    %68 = arith.addf %63, %67 : vector<16x128xf32>
    %c1_36 = arith.constant 1 : index
    %c2_37 = arith.constant 2 : index
    %69 = vector.load %arg4[%c1_36, %c2_37] : memref<24x256xf32, #tpu.memory_space<vmem>>, vector<16x128xf32>
    %c9 = arith.constant 9 : index
    %70 = memref.load %arg1[%c9] : memref<14xf32, #tpu.memory_space<smem>>
    %71 = vector.broadcast %70 : f32 to vector<16x128xf32>
    %72 = arith.mulf %69, %71 : vector<16x128xf32>
    %73 = arith.addf %68, %72 : vector<16x128xf32>
    %c1_38 = arith.constant 1 : index
    %c3_39 = arith.constant 3 : index
    %74 = vector.load %arg4[%c1_38, %c3_39] : memref<24x256xf32, #tpu.memory_space<vmem>>, vector<16x128xf32>
    %c10_40 = arith.constant 10 : index
    %75 = memref.load %arg1[%c10_40] : memref<14xf32, #tpu.memory_space<smem>>
    %76 = vector.broadcast %75 : f32 to vector<16x128xf32>
    %77 = arith.mulf %74, %76 : vector<16x128xf32>
    %78 = arith.addf %73, %77 : vector<16x128xf32>
    %c1_41 = arith.constant 1 : index
    %c4_42 = arith.constant 4 : index
    %79 = vector.load %arg4[%c1_41, %c4_42] : memref<24x256xf32, #tpu.memory_space<vmem>>, vector<16x128xf32>
    %c11 = arith.constant 11 : index
    %80 = memref.load %arg1[%c11] : memref<14xf32, #tpu.memory_space<smem>>
    %81 = vector.broadcast %80 : f32 to vector<16x128xf32>
    %82 = arith.mulf %79, %81 : vector<16x128xf32>
    %83 = arith.addf %78, %82 : vector<16x128xf32>
    %c1_43 = arith.constant 1 : index
    %c5_44 = arith.constant 5 : index
    %84 = vector.load %arg4[%c1_43, %c5_44] : memref<24x256xf32, #tpu.memory_space<vmem>>, vector<16x128xf32>
    %c12 = arith.constant 12 : index
    %85 = memref.load %arg1[%c12] : memref<14xf32, #tpu.memory_space<smem>>
    %86 = vector.broadcast %85 : f32 to vector<16x128xf32>
    %87 = arith.mulf %84, %86 : vector<16x128xf32>
    %88 = arith.addf %83, %87 : vector<16x128xf32>
    %c1_45 = arith.constant 1 : index
    %c6_46 = arith.constant 6 : index
    %89 = vector.load %arg4[%c1_45, %c6_46] : memref<24x256xf32, #tpu.memory_space<vmem>>, vector<16x128xf32>
    %c13 = arith.constant 13 : index
    %90 = memref.load %arg1[%c13] : memref<14xf32, #tpu.memory_space<smem>>
    %91 = vector.broadcast %90 : f32 to vector<16x128xf32>
    %92 = arith.mulf %89, %91 : vector<16x128xf32>
    %93 = arith.addf %88, %92 : vector<16x128xf32>
    %cst_47 = arith.constant 5.000000e-01 : f32
    %94 = vector.broadcast %cst_47 : f32 to vector<16x128xf32>
    %95 = arith.mulf %93, %94 : vector<16x128xf32>
    %96 = arith.mulf %93, %93 : vector<16x128xf32>
    %97 = arith.mulf %96, %93 : vector<16x128xf32>
    %cst_48 = arith.constant 4.471500e-02 : f32
    %98 = vector.broadcast %cst_48 : f32 to vector<16x128xf32>
    %99 = arith.mulf %97, %98 : vector<16x128xf32>
    %100 = arith.addf %93, %99 : vector<16x128xf32>
    %cst_49 = arith.constant 0.797884583 : f32
    %101 = vector.broadcast %cst_49 : f32 to vector<16x128xf32>
    %102 = arith.mulf %100, %101 : vector<16x128xf32>
    %103 = math.tanh %102 : vector<16x128xf32>
    %cst_50 = arith.constant 1.000000e+00 : f32
    %104 = vector.broadcast %cst_50 : f32 to vector<16x128xf32>
    %105 = arith.addf %103, %104 : vector<16x128xf32>
    %106 = arith.mulf %95, %105 : vector<16x128xf32>
    %c0_51 = arith.constant 0 : index
    %c0_52 = arith.constant 0 : index
    %c0_53 = arith.constant 0 : index
    %107 = vector.load %arg3[%c0_51, %c0_52, %c0_53] : memref<2x24x128xf32, #tpu.memory_space<vmem>>, vector<1x8x128xf32>
    %108 = vector.shape_cast %107 : vector<1x8x128xf32> to vector<8x128xf32>
    %109 = vector.shape_cast %14 : vector<8x128xf32> to vector<1x8x128xf32>
    tpu.vector_store %arg3[%c0_51, %c0_52, %c0_53], %109 {strides = array<i32>} : memref<2x24x128xf32, #tpu.memory_space<vmem>>, vector<1x8x128xf32>,
    %110 = vector.extract_strided_slice %106 {offsets = [0, 0], sizes = [8, 128], strides = [1, 1]} : vector<16x128xf32> to vector<8x128xf32>
    %c0_54 = arith.constant 0 : index
    %c8_55 = arith.constant 8 : index
    %c0_56 = arith.constant 0 : index
    %111 = vector.load %arg3[%c0_54, %c8_55, %c0_56] : memref<2x24x128xf32, #tpu.memory_space<vmem>>, vector<1x8x128xf32>
    %112 = vector.shape_cast %111 : vector<1x8x128xf32> to vector<8x128xf32>
    %113 = vector.shape_cast %110 : vector<8x128xf32> to vector<1x8x128xf32>
    tpu.vector_store %arg3[%c0_54, %c8_55, %c0_56], %113 {strides = array<i32>} : memref<2x24x128xf32, #tpu.memory_space<vmem>>, vector<1x8x128xf32>,
    %c0_57 = arith.constant 0 : index
    %c16 = arith.constant 16 : index
    %c0_58 = arith.constant 0 : index
    %114 = vector.load %arg3[%c0_57, %c16, %c0_58] : memref<2x24x128xf32, #tpu.memory_space<vmem>>, vector<1x8x128xf32>
    %115 = vector.shape_cast %114 : vector<1x8x128xf32> to vector<8x128xf32>
    %116 = vector.shape_cast %14 : vector<8x128xf32> to vector<1x8x128xf32>
    tpu.vector_store %arg3[%c0_57, %c16, %c0_58], %116 {strides = array<i32>} : memref<2x24x128xf32, #tpu.memory_space<vmem>>, vector<1x8x128xf32>,
    %c1_59 = arith.constant 1 : index
    %c0_60 = arith.constant 0 : index
    %c0_61 = arith.constant 0 : index
    %117 = vector.load %arg3[%c1_59, %c0_60, %c0_61] : memref<2x24x128xf32, #tpu.memory_space<vmem>>, vector<1x8x128xf32>
    %118 = vector.shape_cast %117 : vector<1x8x128xf32> to vector<8x128xf32>
    %119 = vector.shape_cast %14 : vector<8x128xf32> to vector<1x8x128xf32>
    tpu.vector_store %arg3[%c1_59, %c0_60, %c0_61], %119 {strides = array<i32>} : memref<2x24x128xf32, #tpu.memory_space<vmem>>, vector<1x8x128xf32>,
    %120 = vector.extract_strided_slice %106 {offsets = [8, 0], sizes = [8, 128], strides = [1, 1]} : vector<16x128xf32> to vector<8x128xf32>
    %c1_62 = arith.constant 1 : index
    %c8_63 = arith.constant 8 : index
    %c0_64 = arith.constant 0 : index
    %121 = vector.load %arg3[%c1_62, %c8_63, %c0_64] : memref<2x24x128xf32, #tpu.memory_space<vmem>>, vector<1x8x128xf32>
    %122 = vector.shape_cast %121 : vector<1x8x128xf32> to vector<8x128xf32>
    %123 = vector.shape_cast %120 : vector<8x128xf32> to vector<1x8x128xf32>
    tpu.vector_store %arg3[%c1_62, %c8_63, %c0_64], %123 {strides = array<i32>} : memref<2x24x128xf32, #tpu.memory_space<vmem>>, vector<1x8x128xf32>,
    %c1_65 = arith.constant 1 : index
    %c16_66 = arith.constant 16 : index
    %c0_67 = arith.constant 0 : index
    %124 = vector.load %arg3[%c1_65, %c16_66, %c0_67] : memref<2x24x128xf32, #tpu.memory_space<vmem>>, vector<1x8x128xf32>
    %125 = vector.shape_cast %124 : vector<1x8x128xf32> to vector<8x128xf32>
    %126 = vector.shape_cast %14 : vector<8x128xf32> to vector<1x8x128xf32>
    tpu.vector_store %arg3[%c1_65, %c16_66, %c0_67], %126 {strides = array<i32>} : memref<2x24x128xf32, #tpu.memory_space<vmem>>, vector<1x8x128xf32>,
    return
  }
}

</mosaic_0001>

<bundles_post_ra>
// kernel: model_forward.1
= control target key start
LH: loop header
LB: loop body
LE: loop exit
PB: predicated region body
PF: predicated region fallthrough
CT: control target
= control target key end

     0   :  { %9 = vsyncpa [#allocation5], 0  ;;  %s893_s0 = inlined_call_operand.vmem [shape: f32[2,1,3,24], index: 0, kind: input, shape index: {}]   ;;  %s894_s1 = inlined_call_operand.vmem [shape: f32[14], index: 1, kind: input, shape index: {}]   ;;  %s895_s2 = inlined_call_operand.<no memory space> [shape: f32[1], index: 2, kind: input, shape index: {}]   ;;  %s896_s3 = inlined_call_operand.vmem [shape: f32[2,24,128], index: 3, kind: output, shape index: {}]  }
   0x1   :  { %s18_s14 = sshll.u32 %s894_s1, 4  ;;  %s19_s14 = int_to_ptr.vmem [resolvable:$true] %s18_s14 }
   0x2   :  { %s540_s15 = scalar_lea.vmem %s19_s14, 16  ;;  %p545_p1 = scmp.lt.s32.totalorder %s19_s14, %s19_s14 }
   0x3   :  { %p541_p0 = scmp.ne.s32.totalorder %s19_s14, %s540_s15  ;;  %p546_p2 = scmp.lt.s32.totalorder %s540_s15, %s540_s15 }
   0x5   :  { %p547_p3 = por %p546_p2, %p545_p1 }
   0x7   :  { %p548_p4 = pnand %p547_p3, %p541_p0 }
   0x9   :  { %551 = shalt.err (!%p548_p4)
}
   0xa   :  { %s554_s16 = smov [#allocation4]  }
   0xb   :  { %21 = dma.vmem_to_smem %s19_s14, 16, %s554_s16, [#allocation5]  }
   0xc   :  { %552 = dma.done.wait [#allocation5], 16  }
   0xd   :  { %553 = vsyncadd [#allocation5], 4294967280 }
   0xe   :  { %27 = sfence }
   0xf   :  { %v45_v0 = vld [vmem:[%s893_s0] sm:$0x7]  ;;  %v508_v1 = vld [vmem:[%s893_s0 + $0x4] sm:$0x7]  ;;  %v555_v3 = vmov 0.0   ;;  %s509_s1 = sld [smem:[#allocation4 + $0x1]]  ;;  %v29_v46 = vstv %s895_s2 }
  0x10   :  { %v47_v2 = vrot.slane %v45_v0, 6  ;;  %40 = vst [vmem:[#allocation2 + $0x8] sm:$0xff] %v555_v3  ;;  %39 = vst [vmem:[#allocation2] sm:$0xff] %v555_v3  ;;  %s556_s21 = smov 10   ;;  %v56_v4 = vrot.slane %v508_v1, 6  ;;  %s510_s22 = sld [smem:[#allocation4 + $0x2]]  ;;  %v31_v47 = vmul.f32 %v29_v46, %v29_v46 }
  0x11   :  { %41 = vst [vmem:[#allocation2 + $0x10] sm:$0xff] %v555_v3  ;;  %43 = vst [vmem:[#allocation2 + $0x20] sm:$0xff] %v555_v3  ;;  %s557_s23 = smov 127   ;;  %s511_s0 = sld [smem:[#allocation4 + $0x3]]  ;;  %vm234_vm0 = vcmask 1046528   ;;  %vm51_vm1 = vcmask 274514  }
  0x12   :  { %44 = vst [vmem:[#allocation2 + $0x28] sm:$0xff] %v555_v3  ;;  %48 = vrot.lane.b32.xlu0 %v47_v2, %s556_s21  ;;  %s558_s24 = smov 126   ;;  %s512_s25 = sld [smem:[#allocation4 + $0x4]]  ;;  %v32_v48 = vmul.f32 %v31_v47, %v29_v46  ;;  %vm91_vm2 = vcmask 1039360   ;;  %vm116_vm3 = vcmask 1031168   ;;  %vm141_vm4 = vcmask 1022976  }
  0x13   :  { %s559_s26 = smov 125   ;;  %s513_s27 = sld [smem:[#allocation4 + $0x5]]  ;;  %vm166_vm5 = vcmask 1014784   ;;  %vm191_vm6 = vcmask 1006592   ;;  %vm216_vm7 = vcmask 998400  }
  0x14   :  { %s560_s28 = smov 124   ;;  %s514_s29 = sld [smem:[#allocation4 + $0x6]]  ;;  %v33_v50 = vmul.f32 0.044715, %v32_v48 }
  0x15   :  { %v592_v5 = vstv %s509_s1  ;;  %s516_s30 = sld [smem:[#allocation4 + $0x8]]  ;;  %s561_s4 = smov 123  }
  0x16   :  { %57 = vrot.lane.b32.xlu0 %v56_v4, %s556_s21  ;;  %v76_v6 = vmul.f32 0.0, %v592_v5  ;;  %v596_v7 = vstv %s510_s22  ;;  %s517_s5 = sld [smem:[#allocation4 + $0x9]]  ;;  %s562_s6 = smov 122   ;;  %v34_v52 = vadd.f32 %v33_v50, %v29_v46 }
  0x17   :  { %v101_v8 = vmul.f32 0.0, %v596_v7  ;;  %v601_v9 = vstv %s511_s0  ;;  %v618_v16 = vld [vmem:[#allocation2 + $0x8] sm:$0xfe]  ;;  %s518_s7 = sld [smem:[#allocation4 + $0xa]] }
  0x18   :  { %85 = vrot.lane.b32.xlu1 %v76_v6, %s557_s23  ;;  %v126_v10 = vmul.f32 0.0, %v601_v9  ;;  %v606_v11 = vstv %s512_s25  ;;  %s519_s8 = sld [smem:[#allocation4 + $0xb]]  ;;  %v35_v56 = vmul.f32 0.7978846, %v34_v52 }
  0x19   :  { %v151_v12 = vmul.f32 0.0, %v606_v11  ;;  %v611_v13 = vstv %s513_s27  ;;  %v627_v21 = vld [vmem:[#allocation2 + $0x28] sm:$0x1]  ;;  %s520_s11 = sld [smem:[#allocation4 + $0xc]] }
  0x1a   :  { %v176_v14 = vmul.f32 0.0, %v611_v13  ;;  %v616_v15 = vstv %s514_s29  ;;  %s667_s12 = sld [smem:[#allocation4]]  ;;  %534 = vtanh.f32 %v35_v56 }
  0x1b   :  { %v620_v17 = vstv %s516_s30  ;;  %v201_v18 = vmul.f32 0.0, %v616_v15  ;;  %s521_s2 = sld [smem:[#allocation4 + $0xd]] }
  0x1c   :  { %89 = vrot.lane.b32.xlu1 %v76_v6, %s557_s23  ;;  %v253_v19 = vmul.f32 %v620_v17, %v618_v16  ;;  %v255_v20 = vmul.f32 0.0, %v620_v17  ;;  %v257_v24 = vmul.f32 %v620_v17, %v627_v21  ;;  %v632_v25 = vstv %s517_s5  ;;  %s515_s1 = sld [smem:[#allocation4 + $0x7]] }
  0x1d   :  { %v291_v28 = vmul.f32 %v632_v25, %v618_v16  ;;  %v293_v29 = vmul.f32 0.0, %v632_v25  ;;  %v295_v33 = vmul.f32 %v632_v25, %v627_v21  ;;  %v643_v34 = vstv %s518_s7 }
  0x1e   :  { %v267_v22 = vrot.slane %v253_v19, 1  ;;  %v268_v23 = vrot.slane %v255_v20, 1  ;;  %v272_v27 = vrot.slane %v257_v24, 1  ;;  %v329_v37 = vmul.f32 %v643_v34, %v618_v16 }
  0x1f   :  { %v305_v31 = vrot.slane %v291_v28, 1  ;;  %v306_v32 = vrot.slane %v293_v29, 1  ;;  %v310_v36 = vrot.slane %v295_v33, 1  ;;  %v331_v38 = vmul.f32 0.0, %v643_v34 }
  0x20   :  { %110 = vrot.lane.b32.xlu1 %v101_v8, %s558_s24  ;;  %v269_v26 = vsel %vm234_vm0, %v267_v22, %v268_v23  ;;  %v273_v30 = vsel %vm234_vm0, %v268_v23, %v272_v27  ;;  %v343_v40 = vrot.slane %v329_v37, 1  ;;  %v333_v42 = vmul.f32 %v643_v34, %v627_v21 }
  0x21   :  { %v307_v35 = vsel %vm234_vm0, %v305_v31, %v306_v32  ;;  %v311_v39 = vsel %vm234_vm0, %v306_v32, %v310_v36  ;;  %v344_v41 = vrot.slane %v331_v38, 1  ;;  %v662_v51 = vstv %s519_s8 }
  0x22   :  { %v348_v44 = vrot.slane %v333_v42, 1  ;;  %v367_v54 = vmul.f32 %v662_v51, %v618_v16  ;;  %v369_v55 = vmul.f32 0.0, %v662_v51  ;;  %v371_v61 = vmul.f32 %v662_v51, %v627_v21 }
  0x23   :  { %v345_v43 = vsel %vm234_vm0, %v343_v40, %v344_v41  ;;  %v676_v62 = vstv %s520_s11  ;;  %v64_v6 = vstv %s667_s12  ;;  %v698_v20 = vstv %s521_s2 }
  0x24   :  { %114 = vrot.lane.b32.xlu1 %v101_v8, %s558_s24  ;;  %v349_v45 = vsel %vm234_vm0, %v344_v41, %v348_v44  ;;  %v381_v58 = vrot.slane %v367_v54, 1  ;;  %v382_v59 = vrot.slane %v369_v55, 1  ;;  %v405_v1 = vmul.f32 %v676_v62, %v618_v16 }
  0x25   :  { %v407_v2 = vmul.f32 0.0, %v676_v62  ;;  %v386_v4 = vrot.slane %v371_v61, 1  ;;  %v30_v22 = vmul.f32 0.5, %v29_v46  ;;  %v445_v31 = vmul.f32 0.0, %v698_v20 }
  0x26   :  { %v383_v0 = vsel %vm234_vm0, %v381_v58, %v382_v59  ;;  %v419_v8 = vrot.slane %v405_v1, 1 }
  0x27   :  { %v387_v19 = vsel %vm234_vm0, %v382_v59, %v386_v4  ;;  %v535_v23 = vpop.eup %534 }
  0x28   :  { %135 = vrot.lane.b32.xlu1 %v126_v10, %s559_s26  ;;  %v37_v32 = vadd.f32 1.0, %v535_v23 }
  0x2a   :  { %v38_v33 = vmul.f32 %v37_v32, %v30_v22 }
  0x2c   :  { %139 = vrot.lane.b32.xlu1 %v126_v10, %s559_s26  ;;  %v420_v10 = vrot.slane %v407_v2, 1  ;;  %496 = vst [vmem:[%s896_s3] sm:$0xff] %v38_v33  ;;  %498 = vst [vmem:[%s896_s3 + $0x10] sm:$0xff] %v38_v33 }
  0x2d   :  { %522 = vst [vmem:[%s896_s3 + $0x18] sm:$0xff] %v38_v33  ;;  %524 = vst [vmem:[%s896_s3 + $0x28] sm:$0xff] %v38_v33 }
  0x2e   :  { %v421_v24 = vsel %vm234_vm0, %v419_v8, %v420_v10 }
  0x30   :  { %160 = vrot.lane.b32.xlu1 %v151_v12, %s560_s28 }
  0x34   :  { %164 = vrot.lane.b32.xlu1 %v151_v12, %s560_s28  ;;  %v409_v12 = vmul.f32 %v676_v62, %v627_v21 }
  0x38   :  { %185 = vrot.lane.b32.xlu1 %v176_v14, %s561_s4 }
  0x3c   :  { %189 = vrot.lane.b32.xlu1 %v176_v14, %s561_s4 }
  0x40   :  { %210 = vrot.lane.b32.xlu1 %v201_v18, %s562_s6 }
  0x44   :  { %214 = vrot.lane.b32.xlu1 %v201_v18, %s562_s6 }
  0x48   :  { %276 = vrot.lane.b32.xlu1 %v269_v26, %s557_s23  ;;  %v424_v26 = vrot.slane %v409_v12, 1 }
  0x4a   :  { %v425_v36 = vsel %vm234_vm0, %v420_v10, %v424_v26 }
  0x4c   :  { %280 = vrot.lane.b32.xlu1 %v273_v30, %s557_s23  ;;  %v443_v30 = vmul.f32 %v698_v20, %v618_v16  ;;  %v447_v16 = vmul.f32 %v698_v20, %v627_v21 }
  0x4e   :  { %v462_v41 = vrot.slane %v447_v16, 1 }
  0x50   :  { %314 = vrot.lane.b32.xlu1 %v307_v35, %s558_s24 }
  0x54   :  { %318 = vrot.lane.b32.xlu1 %v311_v39, %s558_s24  ;;  %v458_v39 = vrot.slane %v445_v31, 1 }
  0x56   :  { %v463_v44 = vsel %vm234_vm0, %v458_v39, %v462_v41 }
  0x58   :  { %352 = vrot.lane.b32.xlu1 %v345_v43, %s559_s26 }
  0x5c   :  { %356 = vrot.lane.b32.xlu1 %v349_v45, %s559_s26 }
  0x84   :  { %v49_v49 = vpop.permute.xlu0 %48 }
  0x85   :  { %52 = vst.msk [vmem:[#allocation2] sm:$0x1c] %vm51_vm1, %v49_v49 }
  0x88   :  { %v58_v53 = vpop.permute.xlu0 %57 }
  0x89   :  { %60 = vst.msk [vmem:[#allocation2 + $0x10] sm:$0x1c] %vm51_vm1, %v58_v53  ;;  %v248_v53 = vld [vmem:[#allocation2 + $0x20] sm:$0x1] }
  0x8a   :  { %v256_v56 = vmul.f32 %v620_v17, %v248_v53  ;;  %v294_v2 = vmul.f32 %v632_v25, %v248_v53 }
  0x8c   :  { %v669_v57 = vld [vmem:[#allocation2] sm:$0xff] }
  0x8d   :  { %v75_v60 = vmul.f32 %v592_v5, %v669_v57  ;;  %v65_v14 = vmul.f32 %v669_v57, %v64_v6  ;;  %v100_v18 = vmul.f32 %v596_v7, %v669_v57  ;;  %v125_v37 = vmul.f32 %v601_v9, %v669_v57 }
  0x8e   :  { %v150_v43 = vmul.f32 %v606_v11, %v669_v57  ;;  %v200_v49 = vmul.f32 %v616_v15, %v669_v57 }
  0x8f   :  { %83 = vrot.lane.b32.xlu1 %v75_v60, %s557_s23  ;;  %v702_v27 = vadd.f32 %v65_v14, %v29_v46  ;;  %v270_v60 = vrot.slane %v256_v56, 1 }
  0x90   :  { %v678_v63 = vld [vmem:[#allocation2 + $0x10] sm:$0xff] }
  0x91   :  { %v77_v3 = vmul.f32 %v592_v5, %v678_v63  ;;  %v696_v5 = vpop.permute.xlu1 %85  ;;  %v66_v28 = vmul.f32 %v678_v63, %v64_v6  ;;  %v102_v29 = vmul.f32 %v596_v7, %v678_v63  ;;  %v457_v7 = vrot.slane %v443_v30, 1 }
  0x92   :  { %v127_v21 = vmul.f32 %v601_v9, %v678_v63  ;;  %v152_v9 = vmul.f32 %v606_v11, %v678_v63  ;;  %v177_v48 = vmul.f32 %v611_v13, %v678_v63  ;;  %v244_v11 = vld [vmem:[#allocation2] sm:$0xfe]  ;;  %v254_v52 = vmul.f32 %v620_v17, %v678_v63 }
  0x93   :  { %87 = vrot.lane.b32.xlu0 %v77_v3, %s557_s23  ;;  %390 = vrot.lane.b32.xlu1 %v383_v0, %s560_s28  ;;  %v711_v35 = vadd.f32 %v66_v28, %v29_v46  ;;  %v459_v40 = vsel %vm234_vm0, %v457_v7, %v458_v39  ;;  %v175_v46 = vmul.f32 %v611_v13, %v669_v57  ;;  %v308_v6 = vrot.slane %v294_v2, 1 }
  0x94   :  { %v252_v54 = vmul.f32 %v620_v17, %v244_v11  ;;  %v202_v55 = vmul.f32 %v616_v15, %v678_v63  ;;  %v265_v13 = vrot.slane %v254_v52, 1  ;;  %v292_v61 = vmul.f32 %v632_v25, %v678_v63 }
  0x95   :  { %v717_v38 = vpop.permute.xlu1 %89  ;;  %v290_v0 = vmul.f32 %v632_v25, %v244_v11  ;;  %v330_v8 = vmul.f32 %v643_v34, %v678_v63  ;;  %v328_v12 = vmul.f32 %v643_v34, %v244_v11  ;;  %v332_v25 = vmul.f32 %v643_v34, %v248_v53 }
  0x96   :  { %v264_v58 = vrot.slane %v252_v54, 1  ;;  %v271_v15 = vsel %vm234_vm0, %v265_v13, %v270_v60  ;;  %v303_v17 = vrot.slane %v292_v61, 1  ;;  %v368_v26 = vmul.f32 %v662_v51, %v678_v63 }
  0x97   :  { %108 = vrot.lane.b32.xlu0 %v100_v18, %s558_s24  ;;  %394 = vrot.lane.b32.xlu1 %v387_v19, %s560_s28  ;;  %v302_v3 = vrot.slane %v290_v0, 1  ;;  %v341_v18 = vrot.slane %v330_v8, 1  ;;  %v340_v19 = vrot.slane %v328_v12, 1  ;;  %v366_v28 = vmul.f32 %v662_v51, %v244_v11 }
  0x98   :  { %v266_v59 = vsel %vm234_vm0, %v264_v58, %v265_v13  ;;  %v309_v14 = vsel %vm234_vm0, %v303_v17, %v308_v6  ;;  %v379_v30 = vrot.slane %v368_v26, 1  ;;  %v370_v34 = vmul.f32 %v662_v51, %v248_v53  ;;  %v225_v26 = vld [vmem:[#allocation2 + $0x20] sm:$0x1] }
  0x99   :  { %v739_v42 = vpop.permute.xlu1 %110  ;;  %v304_v4 = vsel %vm234_vm0, %v302_v3, %v303_v17  ;;  %v342_v23 = vsel %vm234_vm0, %v340_v19, %v341_v18  ;;  %v378_v32 = vrot.slane %v366_v28, 1  ;;  %v404_v7 = vmul.f32 %v676_v62, %v244_v11 }
  0x9b   :  { %112 = vrot.lane.b32.xlu0 %v102_v29, %s558_s24  ;;  %428 = vrot.lane.b32.xlu1 %v421_v24, %s561_s4  ;;  %v346_v24 = vrot.slane %v332_v25, 1  ;;  %v380_v33 = vsel %vm234_vm0, %v378_v32, %v379_v30  ;;  %v223_v25 = vld [vmem:[#allocation2] sm:$0xfe] }
  0x9d   :  { %v749_v45 = vpop.permute.xlu1 %114  ;;  %v347_v29 = vsel %vm234_vm0, %v341_v18, %v346_v24 }
  0x9f   :  { %133 = vrot.lane.b32.xlu0 %v125_v37, %s559_s26  ;;  %432 = vrot.lane.b32.xlu1 %v425_v36, %s561_s4  ;;  %v384_v36 = vrot.slane %v370_v34, 1  ;;  %v406_v37 = vmul.f32 %v676_v62, %v678_v63 }
  0xa1   :  { %v755_v47 = vpop.permute.xlu1 %135  ;;  %v385_v16 = vsel %vm234_vm0, %v379_v30, %v384_v36  ;;  %v417_v51 = vrot.slane %v406_v37, 1 }
  0xa3   :  { %137 = vrot.lane.b32.xlu0 %v127_v21, %s559_s26  ;;  %466 = vrot.lane.b32.xlu1 %v459_v40, %s562_s6  ;;  %v408_v21 = vmul.f32 %v676_v62, %v248_v53  ;;  %v416_v40 = vrot.slane %v404_v7, 1  ;;  %v446_v62 = vmul.f32 %v698_v20, %v248_v53 }
  0xa5   :  { %v762_v50 = vpop.permute.xlu1 %139  ;;  %v418_v41 = vsel %vm234_vm0, %v416_v40, %v417_v51  ;;  %v460_v13 = vrot.slane %v446_v62, 1 }
  0xa7   :  { %158 = vrot.lane.b32.xlu0 %v150_v43, %s560_s28  ;;  %470 = vrot.lane.b32.xlu1 %v463_v44, %s562_s6  ;;  %v422_v43 = vrot.slane %v408_v21, 1  ;;  %v444_v44 = vmul.f32 %v698_v20, %v678_v63 }
  0xa9   :  { %v772_v57 = vpop.permute.xlu1 %160 }
  0xab   :  { %162 = vrot.lane.b32.xlu0 %v152_v9, %s560_s28 }
  0xad   :  { %v779_v1 = vpop.permute.xlu1 %164 }
  0xaf   :  { %183 = vrot.lane.b32.xlu0 %v175_v46, %s561_s4  ;;  %v442_v46 = vmul.f32 %v698_v20, %v244_v11 }
  0xb1   :  { %v788_v10 = vpop.permute.xlu1 %185  ;;  %v454_v52 = vrot.slane %v442_v46, 1 }
  0xb3   :  { %187 = vrot.lane.b32.xlu0 %v177_v48, %s561_s4  ;;  %v423_v48 = vsel %vm234_vm0, %v417_v51, %v422_v43 }
  0xb5   :  { %v794_v22 = vpop.permute.xlu1 %189 }
  0xb7   :  { %208 = vrot.lane.b32.xlu0 %v200_v49, %s562_s6  ;;  %v455_v49 = vrot.slane %v444_v44, 1 }
  0xb9   :  { %v804_v31 = vpop.permute.xlu1 %210  ;;  %v461_v56 = vsel %vm234_vm0, %v455_v49, %v460_v13 }
  0xbb   :  { %212 = vrot.lane.b32.xlu0 %v202_v55, %s562_s6  ;;  %v456_v55 = vsel %vm234_vm0, %v454_v52, %v455_v49 }
  0xbd   :  { %v811_v39 = vpop.permute.xlu1 %214 }
  0xbf   :  { %274 = vrot.lane.b32.xlu0 %v266_v59, %s557_s23 }
  0xc1   :  { %v820_v9 = vpop.permute.xlu1 %276 }
  0xc3   :  { %278 = vrot.lane.b32.xlu0 %v271_v15, %s557_s23 }
  0xc5   :  { %v826_v54 = vpop.permute.xlu1 %280 }
  0xc7   :  { %312 = vrot.lane.b32.xlu0 %v304_v4, %s558_s24 }
  0xc9   :  { %v832_v11 = vpop.permute.xlu1 %314 }
  0xcb   :  { %316 = vrot.lane.b32.xlu0 %v309_v14, %s558_s24 }
  0xcd   :  { %v834_v58 = vpop.permute.xlu1 %318 }
  0xcf   :  { %350 = vrot.lane.b32.xlu0 %v342_v23, %s559_s26 }
  0xd1   :  { %v836_v59 = vpop.permute.xlu1 %352 }
  0xd3   :  { %354 = vrot.lane.b32.xlu0 %v347_v29, %s559_s26 }
  0xd5   :  { %v838_v20 = vpop.permute.xlu1 %356 }
  0xd7   :  { %388 = vrot.lane.b32.xlu0 %v380_v33, %s560_s28 }
  0xdb   :  { %392 = vrot.lane.b32.xlu0 %v385_v16, %s560_s28 }
  0xdf   :  { %426 = vrot.lane.b32.xlu0 %v418_v41, %s561_s4 }
  0xe3   :  { %430 = vrot.lane.b32.xlu0 %v423_v48, %s561_s4 }
  0xe7   :  { %464 = vrot.lane.b32.xlu0 %v456_v55, %s562_s6 }
  0xeb   :  { %468 = vrot.lane.b32.xlu0 %v461_v56, %s562_s6 }
 0x101   :  { %v84_v53 = vpop.permute.xlu1 %83 }
 0x102   :  { %v92_v61 = vsel %vm91_vm2, %v84_v53, %v696_v5 }
 0x103   :  { %v96_v17 = vadd.f32 %v92_v61, %v702_v27 }
 0x105   :  { %v88_v60 = vpop.permute.xlu0 %87  ;;  %v391_v52 = vpop.permute.xlu1 %390 }
 0x106   :  { %v93_v0 = vsel %vm91_vm2, %v88_v60, %v717_v38 }
 0x107   :  { %v97_v15 = vadd.f32 %v93_v0, %v711_v35 }
 0x109   :  { %v109_v2 = vpop.permute.xlu0 %108  ;;  %v395_v13 = vpop.permute.xlu1 %394 }
 0x10a   :  { %v117_v3 = vsel %vm116_vm3, %v109_v2, %v739_v42  ;;  %v227_v42 = vstv %s515_s1 }
 0x10b   :  { %v121_v4 = vadd.f32 %v117_v3, %v96_v17  ;;  %v228_v30 = vmul.f32 %v227_v42, %v223_v25  ;;  %v230_v33 = vmul.f32 %v227_v42, %v225_v26 }
 0x10d   :  { %v113_v6 = vpop.permute.xlu0 %112  ;;  %v235_v7 = vrot.slane %v228_v30, 1  ;;  %v238_v21 = vrot.slane %v230_v33, 1  ;;  %v429_v60 = vpop.permute.xlu1 %428 }
 0x10e   :  { %v118_v8 = vsel %vm116_vm3, %v113_v6, %v749_v45  ;;  %v229_v45 = vmul.f32 %v227_v42, %v678_v63 }
 0x10f   :  { %v122_v12 = vadd.f32 %v118_v8, %v97_v15 }
 0x110   :  { %v236_v32 = vrot.slane %v229_v45, 1 }
 0x111   :  { %v134_v14 = vpop.permute.xlu0 %133  ;;  %v433_v15 = vpop.permute.xlu1 %432 }
 0x112   :  { %v142_v27 = vsel %vm141_vm4, %v134_v14, %v755_v47  ;;  %v237_v51 = vsel %vm234_vm0, %v235_v7, %v236_v32  ;;  %v239_v46 = vsel %vm234_vm0, %v236_v32, %v238_v21 }
 0x113   :  { %v146_v23 = vadd.f32 %v142_v27, %v121_v4 }
 0x115   :  { %v138_v5 = vpop.permute.xlu0 %137 }
 0x116   :  { %v143_v28 = vsel %vm141_vm4, %v138_v5, %v762_v50 }
 0x119   :  { %v159_v18 = vpop.permute.xlu0 %158 }
 0x11a   :  { %v167_v19 = vsel %vm166_vm5, %v159_v18, %v772_v57  ;;  %v147_v57 = vadd.f32 %v143_v28, %v122_v12  ;;  %v467_v18 = vpop.permute.xlu1 %466 }
 0x11b   :  { %v171_v34 = vadd.f32 %v167_v19, %v146_v23 }
 0x11d   :  { %v163_v38 = vpop.permute.xlu0 %162 }
 0x11e   :  { %v168_v47 = vsel %vm166_vm5, %v163_v38, %v779_v1 }
 0x11f   :  { %v172_v16 = vadd.f32 %v168_v47, %v147_v57 }
 0x121   :  { %v184_v35 = vpop.permute.xlu0 %183 }
 0x122   :  { %v192_v29 = vsel %vm191_vm6, %v184_v35, %v788_v10 }
 0x123   :  { %v196_v36 = vadd.f32 %v192_v29, %v171_v34 }
 0x125   :  { %v188_v24 = vpop.permute.xlu0 %187 }
 0x126   :  { %v193_v37 = vsel %vm191_vm6, %v188_v24, %v794_v22  ;;  %v471_v24 = vpop.permute.xlu1 %470 }
 0x127   :  { %v197_v40 = vadd.f32 %v193_v37, %v172_v16 }
 0x129   :  { %v209_v63 = vpop.permute.xlu0 %208 }
 0x12a   :  { %v217_v50 = vsel %vm216_vm7, %v209_v63, %v804_v31 }
 0x12b   :  { %v221_v10 = vadd.f32 %v217_v50, %v196_v36 }
 0x12d   :  { %v213_v41 = vpop.permute.xlu0 %212  ;;  %v242_v1 = vadd.f32 %v237_v51, %v221_v10 }
 0x12e   :  { %v218_v43 = vsel %vm216_vm7, %v213_v41, %v811_v39 }
 0x12f   :  { %v222_v44 = vadd.f32 %v218_v43, %v197_v40 }
 0x131   :  { %v275_v48 = vpop.permute.xlu0 %274  ;;  %v243_v22 = vadd.f32 %v239_v46, %v222_v44 }
 0x132   :  { %v282_v0 = vsel %vm91_vm2, %v275_v48, %v820_v9 }
 0x133   :  { %v286_v17 = vadd.f32 %v282_v0, %v242_v1 }
 0x135   :  { %v279_v49 = vpop.permute.xlu0 %278 }
 0x136   :  { %v283_v3 = vsel %vm91_vm2, %v279_v49, %v826_v54 }
 0x137   :  { %v287_v14 = vadd.f32 %v283_v3, %v243_v22 }
 0x139   :  { %v313_v62 = vpop.permute.xlu0 %312 }
 0x13a   :  { %v320_v39 = vsel %vm116_vm3, %v313_v62, %v832_v11 }
 0x13b   :  { %v324_v6 = vadd.f32 %v320_v39, %v286_v17 }
 0x13d   :  { %v317_v31 = vpop.permute.xlu0 %316 }
 0x13e   :  { %v321_v8 = vsel %vm116_vm3, %v317_v31, %v834_v58 }
 0x13f   :  { %v325_v35 = vadd.f32 %v321_v8, %v287_v14 }
 0x141   :  { %v351_v55 = vpop.permute.xlu0 %350 }
 0x142   :  { %v358_v4 = vsel %vm141_vm4, %v351_v55, %v836_v59 }
 0x143   :  { %v362_v9 = vadd.f32 %v358_v4, %v324_v6 }
 0x145   :  { %v355_v56 = vpop.permute.xlu0 %354 }
 0x146   :  { %v359_v11 = vsel %vm141_vm4, %v355_v56, %v838_v20 }
 0x147   :  { %v363_v59 = vadd.f32 %v359_v11, %v325_v35 }
 0x149   :  { %v389_v53 = vpop.permute.xlu0 %388 }
 0x14a   :  { %v396_v12 = vsel %vm166_vm5, %v389_v53, %v391_v52 }
 0x14b   :  { %v400_v54 = vadd.f32 %v396_v12, %v362_v9 }
 0x14d   :  { %v393_v61 = vpop.permute.xlu0 %392 }
 0x14e   :  { %v397_v27 = vsel %vm166_vm5, %v393_v61, %v395_v13 }
 0x14f   :  { %v401_v45 = vadd.f32 %v397_v27, %v363_v59 }
 0x151   :  { %v427_v2 = vpop.permute.xlu0 %426 }
 0x152   :  { %v434_v38 = vsel %vm191_vm6, %v427_v2, %v429_v60 }
 0x153   :  { %v438_v25 = vadd.f32 %v434_v38, %v400_v54 }
 0x155   :  { %v431_v5 = vpop.permute.xlu0 %430 }
 0x156   :  { %v435_v58 = vsel %vm191_vm6, %v431_v5, %v433_v15 }
 0x157   :  { %v439_v26 = vadd.f32 %v435_v58, %v401_v45 }
 0x159   :  { %v465_v42 = vpop.permute.xlu0 %464 }
 0x15a   :  { %v472_v19 = vsel %vm216_vm7, %v465_v42, %v467_v18 }
 0x15b   :  { %v476_v23 = vadd.f32 %v472_v19, %v438_v25 }
 0x15d   :  { %v480_v28 = vmul.f32 %v476_v23, %v476_v23  ;;  %v469_v29 = vpop.permute.xlu0 %468  ;;  %v478_v16 = vmul.f32 0.5, %v476_v23 }
 0x15e   :  { %v473_v20 = vsel %vm216_vm7, %v469_v29, %v471_v24 }
 0x15f   :  { %v482_v30 = vmul.f32 %v480_v28, %v476_v23  ;;  %v477_v34 = vadd.f32 %v473_v20, %v439_v26 }
 0x161   :  { %v484_v47 = vmul.f32 0.044715, %v482_v30  ;;  %v481_v32 = vmul.f32 %v477_v34, %v477_v34  ;;  %v479_v40 = vmul.f32 0.5, %v477_v34 }
 0x163   :  { %v486_v33 = vadd.f32 %v484_v47, %v476_v23  ;;  %v483_v57 = vmul.f32 %v481_v32, %v477_v34 }
 0x165   :  { %v488_v36 = vmul.f32 0.7978846, %v486_v33  ;;  %v485_v63 = vmul.f32 0.044715, %v483_v57 }
 0x167   :  { %536 = vtanh.f32 %v488_v36  ;;  %v487_v37 = vadd.f32 %v485_v63, %v477_v34 }
 0x169   :  { %v489_v50 = vmul.f32 0.7978846, %v487_v37 }
 0x16b   :  { %538 = vtanh.f32 %v489_v50 }
 0x174   :  { %v537_v7 = vpop.eup %536 }
 0x175   :  { %v492_v10 = vadd.f32 1.0, %v537_v7 }
 0x177   :  { %v494_v51 = vmul.f32 %v492_v10, %v478_v16 }
 0x178   :  { %v539_v21 = vpop.eup %538 }
 0x179   :  { %497 = vst [vmem:[%s896_s3 + $0x8] sm:$0xff] %v494_v51  ;;  %v493_v41 = vadd.f32 1.0, %v539_v21 }
 0x17b   :  { %v495_v1 = vmul.f32 %v493_v41, %v479_v40 }
 0x17d   :  { %523 = vst [vmem:[%s896_s3 + $0x20] sm:$0xff] %v495_v1 }
 0x17e   :  { %507 = vsyncpa [#allocation5], 1 }

</bundles_post_ra>
